<compile_context>
chip_gen: v5e
topology: v5e:2x2
jax: 0.10.0
libtpu: 0.0.40
codegen_flags: <defaults>
</compile_context>

<pallas_src>
import functools
import math

import jax
import jax.numpy as jnp
from jax.experimental import pallas as pl
from jax.experimental.pallas import tpu as pltpu

_LANE = 128


def _round_up(x, m):
    return ((x + m - 1) // m) * m


def _sublane_multiple(dtype):
    # Physical VMEM tile is (8, 128) 32-bit words; narrower dtypes pack 2x/4x
    # rows per sublane, so padded row counts come in 8 / 16 / 32 chunks.
    return max(8, 32 // jnp.dtype(dtype).itemsize)


def _phys_block_bytes(block_shape, dtype):
    """Physical VMEM bytes of one block, including (sublane, lane) padding."""
    itemsize = jnp.dtype(dtype).itemsize
    sub = _sublane_multiple(dtype)
    lead = math.prod(block_shape[:-2]) if len(block_shape) > 2 else 1
    rows, lanes = block_shape[-2], block_shape[-1]
    return lead * _round_up(rows, sub) * _round_up(lanes, _LANE) * itemsize


_BUDGETS = None


def _vmem_budgets():
    """(pair_budget_bytes, vmem_limit_bytes), chip-aware.

    pair_budget bounds the double-buffered (input block + output block)
    footprint.  Conservative on v7x (64 MiB VMEM per TensorCore), roomier on
    v5e / v6e (128 MiB VMEM).
    """
    global _BUDGETS
    if _BUDGETS is None:
        vmem_cap = 64 * 1024 * 1024  # conservative default (v7x-sized)
        try:
            cap = getattr(pltpu.get_tpu_info(), "vmem_capacity_bytes", None)
            if cap:
                vmem_cap = int(cap)
        except Exception:
            pass
        if vmem_cap >= 96 * 1024 * 1024:        # v5e / v6e: 128 MiB VMEM
            _BUDGETS = (32 * 1024 * 1024, 64 * 1024 * 1024)
        else:                                   # v7x: 64 MiB VMEM per TC
            _BUDGETS = (24 * 1024 * 1024, 48 * 1024 * 1024)
    return _BUDGETS


# ----------------------------- kernels -------------------------------------


def _flat_swap_kernel(m, n, x_ref, o_ref):
    # x_ref, o_ref: (tb, m*n) lane-dense flat rows.  The minor-axis swap is
    # done in-register (reshape -> XLU transpose -> reshape) so both HBM
    # transfers stay >=128 lanes wide (unmasked vld/vst) instead of an m-lane
    # masked store per output row.
    tb = x_ref.shape[0]
    x = x_ref[...].reshape(tb, m, n)
    o_ref[...] = jnp.swapaxes(x, 1, 2).reshape(tb, n * m)


def _swap3d_kernel(x_ref, o_ref):
    # x_ref: (tb, M, N) or (1, TM, TN); o_ref: (tb, N, M) or (1, TN, TM).
    # Only the in-tile swap uses the XLU; any coarse (block-level) transpose
    # is expressed in the output BlockSpec index_map (DMA addressing).
    o_ref[...] = jnp.swapaxes(x_ref[...], 1, 2)


# --------------------------- tiling helpers ---------------------------------


def _cap_tb(tb, B, sub):
    """Rows per grid step: fit budget, expose >=~8 steps, keep sublane-aligned."""
    tb = max(1, min(tb, B))
    # v7x has 2 TensorCores sharing HBM: never fold all of B into one step.
    tb = min(tb, max(1, pl.cdiv(B, 8)))
    if tb >= sub:
        tb = (tb // sub) * sub
    return tb


def _transpose_small_flat(x, B, M, N, pair_budget, vmem_limit, cost):
    """Lane-dense flattened path for small (M, N) slabs (the PatchTST case)."""
    dtype = x.dtype
    itemsize = jnp.dtype(dtype).itemsize
    sub = _sublane_multiple(dtype)
    L = M * N
    row_bytes = _round_up(L, _LANE) * itemsize          # lane-padded flat row
    # Double-buffered (in + out) pair of (tb, L) blocks ~= 4 * tb_pad * row_bytes.
    tb = (pair_budget // (4 * row_bytes)) // sub * sub
    tb = _cap_tb(max(tb, 1), B, sub)

    out = pl.pallas_call(
        functools.partial(_flat_swap_kernel, M, N),
        out_shape=jax.ShapeDtypeStruct((B, L), dtype),
        grid_spec=pl.GridSpec(
            grid=(pl.cdiv(B, tb),),                     # partial last block is masked
            in_specs=[pl.BlockSpec((tb, L), lambda b: (b, 0))],
            out_specs=pl.BlockSpec((tb, L), lambda b: (b, 0)),
        ),
        compiler_params=pltpu.CompilerParams(
            dimension_semantics=("parallel",),
            vmem_limit_bytes=vmem_limit,
        ),
        cost_estimate=cost,
    )(x.reshape(B, L))
    return out.reshape(B, N, M)


def _transpose_small_3d(x, B, M, N, pair_budget, vmem_limit, cost):
    """Fallback small path (3-D blocks, masked stores) -- correctness identical."""
    dtype = x.dtype
    sub = _sublane_multiple(dtype)
    unit = _phys_block_bytes((1, M, N), dtype) + _phys_block_bytes((1, N, M), dtype)
    tb = _cap_tb(max(1, pair_budget // (2 * unit)), B, sub)

    return pl.pallas_call(
        _swap3d_kernel,
        out_shape=jax.ShapeDtypeStruct((B, N, M), dtype),
        grid_spec=pl.GridSpec(
            grid=(pl.cdiv(B, tb),),
            in_specs=[pl.BlockSpec((tb, M, N), lambda b: (b, 0, 0))],
            out_specs=pl.BlockSpec((tb, N, M), lambda b: (b, 0, 0)),
        ),
        compiler_params=pltpu.CompilerParams(
            dimension_semantics=("parallel",),
            vmem_limit_bytes=vmem_limit,
        ),
        cost_estimate=cost,
    )(x)


_FLAT_SMALL_OK = None  # memo: does reshape-in-kernel lower on this jax/Mosaic?


def _transpose_small(x, B, M, N, pair_budget, vmem_limit, cost):
    global _FLAT_SMALL_OK
    if _FLAT_SMALL_OK is not False:
        try:
            out = _transpose_small_flat(x, B, M, N, pair_budget, vmem_limit, cost)
            _FLAT_SMALL_OK = True
            return out
        except Exception:
            _FLAT_SMALL_OK = False
    return _transpose_small_3d(x, B, M, N, pair_budget, vmem_limit, cost)


def _transpose_tiled(x, B, M, N, pair_budget, vmem_limit, cost):
    """Large-slab path: 128-aligned (tm, tn) tiles, block transpose via DMA."""
    dtype = x.dtype
    itemsize = jnp.dtype(dtype).itemsize

    # Prefer a wide tn (long contiguous HBM reads per DMA row), then give tm
    # the rest of the double-buffered pair budget.  Both stay multiples of 128.
    max_elems = pair_budget // (4 * itemsize)           # tm * tn upper bound
    tn = min(_round_up(N, _LANE), 2048)
    tn = min(tn, max(_LANE, (max_elems // _LANE) // _LANE * _LANE))
    tm = min(_round_up(M, _LANE), 1024)
    tm = min(tm, max(_LANE, (max_elems // tn) // _LANE * _LANE))

    # v7x megacore: guarantee >=2 parallel grid steps so both TensorCores get
    # work (a single-step grid caps the kernel at ~half the chip bandwidth).
    if B * pl.cdiv(M, tm) * pl.cdiv(N, tn) < 2:
        if M > _LANE:
            tm = max(_LANE, _round_up(pl.cdiv(M, 2), _LANE))
        elif N > _LANE:
            tn = max(_LANE, _round_up(pl.cdiv(N, 2), _LANE))

    assert 4 * tm * tn * itemsize <= pair_budget, (tm, tn, dtype)

    grid = (B, pl.cdiv(M, tm), pl.cdiv(N, tn))          # ragged edges are masked
    return pl.pallas_call(
        _swap3d_kernel,
        out_shape=jax.ShapeDtypeStruct((B, N, M), dtype),
        grid_spec=pl.GridSpec(
            grid=grid,
            in_specs=[pl.BlockSpec((1, tm, tn), lambda b, i, j: (b, i, j))],
            # Coarse (block-level) transpose is pure DMA addressing:
            # output block (j, i) <- input block (i, j).
            out_specs=pl.BlockSpec((1, tn, tm), lambda b, i, j: (b, j, i)),
        ),
        compiler_params=pltpu.CompilerParams(
            dimension_semantics=("parallel", "parallel", "parallel"),
            vmem_limit_bytes=vmem_limit,
        ),
        cost_estimate=cost,
    )(x)


# ------------------------------ dispatcher ----------------------------------


def _transpose_last2(x):
    """Pallas transpose of the two minor axes: (B, M, N) -> (B, N, M)."""
    B, M, N = x.shape
    dtype = x.dtype
    itemsize = jnp.dtype(dtype).itemsize
    sub = _sublane_multiple(dtype)
    pair_budget, vmem_limit = _vmem_budgets()

    # Pure bandwidth kernel: zero flops, read + write every element once.
    cost = pl.CostEstimate(
        flops=0, transcendentals=0, bytes_accessed=2 * B * M * N * itemsize
    )

    # Small / flattened path: a minor dim below one lane (128) would force
    # masked, 16x lane-padded stores on the tiled path, so flatten instead --
    # provided even the minimum-height flat block pair fits the VMEM budget.
    row_bytes = _round_up(M * N, _LANE) * itemsize
    if min(M, N) < _LANE and 4 * sub * row_bytes <= pair_budget:
        return _transpose_small(x, B, M, N, pair_budget, vmem_limit, cost)

    # TODO(synk): a huge M*N slab with min(M, N) < 128 still lands on the
    # tiled path and pays masked-edge waste; a two-level (flatten + tile)
    # scheme would be needed for that (unused in PatchTST) corner.
    return _transpose_tiled(x, B, M, N, pair_budget, vmem_limit, cost)


def pallas_transpose(x, *dims, contiguous=False):
    """Equivalent of torch `Transpose(*dims, contiguous=...).forward(x)`."""
    assert len(dims) == 2, "Transpose module swaps exactly two dims"
    del contiguous  # JAX results are always fresh dense arrays
    d0, d1 = (d % x.ndim for d in dims)
    if d0 == d1:
        return x

    lo, hi = sorted((d0, d1))
    if x.ndim >= 2 and (lo, hi) == (x.ndim - 2, x.ndim - 1) and x.size > 0:
        # Pallas fast path: swap of the two minor axes (the PatchTST usage).
        lead = x.shape[:-2]
        M, N = x.shape[-2:]
        B = math.prod(lead) if lead else 1
        y = _transpose_last2(x.reshape(B, M, N))
        return y.reshape(*lead, N, M)

    # TODO(synk): Pallas fast path only covers swapping the two minor axes
    # (PatchTST's Transpose(1, 2)); other dim pairs fall back to XLA.
    return jnp.swapaxes(x, d0, d1)


if __name__ == "__main__":
    key = jax.random.PRNGKey(0)

    # 1) PatchTST-style usage: Transpose(1, 2) on small (B, n_vars, seq) acts.
    x = jax.random.normal(key, (2, 8, 32), dtype=jnp.float32)
    y = jax.block_until_ready(pallas_transpose(x, 1, 2, contiguous=True))
    assert y.shape == (2, 32, 8)
    assert jnp.array_equal(y, jnp.swapaxes(x, 1, 2)), "small-path mismatch"

    # 2) Small path with many batch rows (partial last batch block).
    x1 = jax.random.normal(jax.random.PRNGKey(1), (100, 8, 32), dtype=jnp.float32)
    y1 = jax.block_until_ready(pallas_transpose(x1, 1, 2))
    assert jnp.array_equal(y1, jnp.swapaxes(x1, 1, 2)), "ragged-batch mismatch"

    # 3) Tiled path: 128-aligned dims, block transpose via the out index_map.
    x2 = jax.random.normal(jax.random.PRNGKey(2), (1, 1024, 768), dtype=jnp.float32)
    y2 = jax.block_until_ready(pallas_transpose(x2, 1, 2))
    assert y2.shape == (1, 768, 1024)
    assert jnp.array_equal(y2, jnp.swapaxes(x2, 1, 2)), "tiled-path mismatch"

    # 4) Tiled path with non-128-divisible dims (masked edge tiles).
    x3 = jax.random.normal(jax.random.PRNGKey(3), (2, 384, 200), dtype=jnp.float32)
    y3 = jax.block_until_ready(pallas_transpose(x3, 1, 2))
    assert jnp.array_equal(y3, jnp.swapaxes(x3, 1, 2)), "masked-edge mismatch"

    # 5) Non-minor-axis swap: falls back to XLA (outside the Pallas fast path).
    x4 = jax.random.normal(jax.random.PRNGKey(4), (2, 4, 8, 16), dtype=jnp.float32)
    y4 = jax.block_until_ready(pallas_transpose(x4, 1, 3))
    assert jnp.array_equal(y4, jnp.swapaxes(x4, 1, 3)), "fallback mismatch"

    print("KERNEL_OK")
</pallas_src>

<mosaic_0001>
module attributes {stable_mosaic.version = 11 : i64} {
  func.func @_swap3d_kernel(%arg0: i32, %arg1: memref<1x8x32xf32, #tpu.memory_space<vmem>>, %arg2: memref<1x32x8xf32, #tpu.memory_space<vmem>>) attributes {dimension_semantics = [#tpu.dimension_semantics<parallel>], iteration_bounds = array<i64: 2>, scalar_prefetch = 0 : i64, scratch_operands = 0 : i64, tpu.core_type = #tpu.core_type<tc>, window_params = [{transform_indices = @transform_0, window_bounds = array<i64: 1, 8, 32>}, {transform_indices = @transform_1, window_bounds = array<i64: 1, 32, 8>}]} {
    %c0 = arith.constant 0 : index
    %c0_0 = arith.constant 0 : index
    %c0_1 = arith.constant 0 : index
    %0 = vector.load %arg1[%c0, %c0_0, %c0_1] : memref<1x8x32xf32, #tpu.memory_space<vmem>>, vector<1x8x32xf32>
    %1 = tpu.transpose %0, [0, 2, 1] : vector<1x8x32xf32> -> vector<1x32x8xf32>
    %c0_2 = arith.constant 0 : index
    %c0_3 = arith.constant 0 : index
    %c0_4 = arith.constant 0 : index
    %2 = vector.load %arg2[%c0_2, %c0_3, %c0_4] : memref<1x32x8xf32, #tpu.memory_space<vmem>>, vector<1x32x8xf32>
    tpu.vector_store %arg2[%c0_2, %c0_3, %c0_4], %1 {strides = array<i32>} : memref<1x32x8xf32, #tpu.memory_space<vmem>>, vector<1x32x8xf32>,
    return
  }
  func.func @transform_0(%arg0: i32) -> (i32, i32, i32) {
    %c0_i32 = arith.constant 0 : i32
    %c0_i32_0 = arith.constant 0 : i32
    %c0_i32_1 = arith.constant 0 : i32
    return %arg0, %c0_i32, %c0_i32_0 : i32, i32, i32
  }
  func.func @transform_1(%arg0: i32) -> (i32, i32, i32) {
    %c0_i32 = arith.constant 0 : i32
    %c0_i32_0 = arith.constant 0 : i32
    %c0_i32_1 = arith.constant 0 : i32
    return %arg0, %c0_i32, %c0_i32_0 : i32, i32, i32
  }
}

</mosaic_0001>

<bundles_post_ra>
// kernel: tpu_custom_call.1
= control target key start
LH: loop header
LB: loop body
LE: loop exit
PB: predicated region body
PF: predicated region fallthrough
CT: control target
= control target key end

     0   :  { %6 = vsyncpa [#allocation3], 0  ;;  %s463_s0 = inlined_call_operand.hbm [shape: f32[2,8,32], index: 0, kind: input, shape index: {}]   ;;  %s464_s1 = inlined_call_operand.vmem [shape: f32[2,32,8], index: 1, kind: output, shape index: {}]  }
   0x1   :  { %8 = vsyncpa [#allocation3 + $0x1], 0  ;;  %s369_s6 = smov 0   ;;  %s371_s7 = smov 0  }
   0x2   :  { %s373_s8 = smov 0   ;;  %s375_s9 = smov 0  }
   0x3 LB: > { %s388_s10 = sadd.s32 4294967295, %s357_s9   ;;  %s391_s11 = sadd.s32 1, %s357_s9   ;;  %s357_s9 = sphi %s375_s9, %s471_s9   ;;  %s353_s8 = sphi %s373_s8, %s470_s8   ;;  %s349_s7 = sphi %s371_s7, %s469_s7   ;;  %s345_s6 = sphi %s369_s6, %s468_s6  }
   0x4   : > { %s18_s12 = ssub.s32 %s357_s9, %s391_s11  ;;  %s21_s13 = sadd.s32 1, %s353_s8 }
   0x5   : > { %p19_p0 = scmp.eq.s32.totalorder %s18_s12, 0  ;;  %p28_p1 = scmp.ne.s32.totalorder %s353_s8, %s349_s7 }
   0x6   : > { %p29_p2 = scmp.eq.s32.totalorder %s357_s9, 0  ;;  %p34_p3 = scmp.ne.s32.totalorder %s349_s7, %s345_s6 }
   0x7   : > { %s401_s14 = scalar_select %p19_p0, %s353_s8, %s21_s13  }
   0x8   : > { %p403_p4 = por %p29_p2, %p28_p1  ;;  %p35_p5 = scmp.eq.s32.totalorder %s388_s10, 0 }
   0x9   : > { %p259_p6 = scmp.lt.s32.totalorder %s357_s9, 2  ;;  %s84_s17 = sand.u32 1, %s353_s8  }
   0xa   : > { %p409_p7 = por %p35_p5, %p34_p3  ;;  %s244_s18 = sshll.u32 %s84_s17, 3 }
   0xb   : > { %s245_s19 = sshll.u32 %s357_s9, 3  ;;  %s88_s23 = scalar_lea.vmem [#allocation2], %s244_s18 }
   0xc   : > { %s92_s22 = scalar_lea.hbm %s463_s0, %s245_s19  ;;  %s96_s24 = sshll.u32 %s88_s23, 4  ;;  %s97_s24 = int_to_ptr.vmem [resolvable:$true] %s96_s24 }
   0xd   : > { %s94_s25 = sshll.u32 %s92_s22, 4  ;;  %p420_p8 = pnand %p259_p6, %p403_p4  ;;  %s95_s25 = int_to_ptr.hbm [resolvable:$true] %s94_s25 }
   0xe   : > { %p246_p9 = scmp.ge.s32.totalorder %s357_s9, 1  ;;  %p101_p10 = scmp.lt.s32.totalorder %s357_s9, 3 }
   0xf   : > { %s85_s27 = scalar_lea.sflag [#allocation3], %s84_s17  ;;  %s293_s28 = sshra.s32 %s95_s25, 4  ;;  %s294_s28 = int_to_ptr.hbm [resolvable:$true] %s293_s28 }
  0x10   : > { %s295_s29 = scalar_lea.hbm %s294_s28, 8  ;;  %p297_p12 = pneg %p420_p8 }
  0x11   : > { %p296_p11 = scmp.ne.s32.totalorder %s294_s28, %s295_s29  ;;  %s300_s3 = scalar_lea.hbm %s463_s0, 16 }
  0x12   : > { %p301_p1 = scmp.lt.s32.totalorder %s294_s28, %s463_s0  ;;  %p302_p2 = scmp.lt.s32.totalorder %s300_s3, %s295_s29 }
  0x13   : > { %p298_p13 = pnand %p297_p12, %p296_p11 }
  0x14   : > { %p303_p3 = por %p302_p2, %p301_p1 }
  0x15   : > { %p299_p0 = pneg %p298_p13 }
  0x17   : > { %p304_p4 = pnand %p303_p3, %p299_p0 }
  0x19   : > { %307 = shalt.err (!%p304_p4)
}
  0x1a   : > { %258 = dma.hbm_to_vmem [thread:$0]  (!%p420_p8), %s95_s25, 128, %s97_s24, %s85_s27  }
  0x1b   : > { %p102_p5 = pnand %p246_p9, %p101_p10 }
  0x1c   : > { %s107_s6 = sand.u32 (!%p102_p5), 1, %s349_s7  }
  0x1d   : > { %105 = sbr.rel (%p102_p5) target bundleno = 226 (0xe2), region = 24  ;;  %s247_s12 = sshll.u32 (!%p102_p5), %s107_s6, 3 }
  0x1e   : > { %s108_s13 = scalar_lea.sflag (!%p102_p5), [#allocation3], %s107_s6  ;;  %s111_s15 = scalar_lea.vmem (!%p102_p5), [#allocation2], %s247_s12 }
  0x22   : > { %340 = dma.done.wait (%p409_p7), %s108_s13, 128  }
  0x23   : > { %342 = vsyncadd (%p409_p7), %s108_s13, 4294967168  ;;  %v136_v0 = vld [vmem:[%s111_s15] sm:$0xff]  ;;  %p131_p6 = scmp.lt.s32.totalorder %s388_s10, 1  ;;  %vm169_vm0 = vcmask 64512  }
  0x24   : > { %137 = vxpose.xlu0.b32.start.end [1/1] (short) (narrow) %v136_v0, 32 }
  0x25   : > { %s473_s10 = smov (!%p131_p6, %s388_s10), 1 }
  0x26   : > { %s252_s9 = sshll.u32 %s473_s10, 5 }
  0x27   : > { %s135_s19 = scalar_lea.vmem %s464_s1, %s252_s9 }
  0xc8   : > { %v153_v1 = vpop.trf.xlu0 }
  0xc9   : > { %170 = vst.msk [vmem:[%s135_s19] sm:$0xff] %vm169_vm0, %v153_v1 }
  0xd0   : > { %v154_v2 = vpop.trf.xlu0 }
  0xd1   : > { %171 = vst.msk [vmem:[%s135_s19 + $0x8] sm:$0xff] %vm169_vm0, %v154_v2 }
  0xd8   : > { %v155_v3 = vpop.trf.xlu0 }
  0xd9   : > { %172 = vst.msk [vmem:[%s135_s19 + $0x10] sm:$0xff] %vm169_vm0, %v155_v3 }
  0xe0   : > { %v156_v4 = vpop.trf.xlu0 }
  0xe1   : > { %173 = vst.msk [vmem:[%s135_s19 + $0x18] sm:$0xff] %vm169_vm0, %v156_v4 }
  0xe2 PF: > { %p11_p7 = scmp.ge.s32.totalorder %s391_s11, 4   ;;  %s468_s6 = smov %s349_s7 }
  0xe3   : > { %s469_s7 = smov %s353_s8  ;;  %s470_s8 = smov %s401_s14 }
  0xe4   : > { %s471_s9 = smov %s391_s11  ;;  %13 = sbr.rel (!%p11_p7) target bundleno = 3 (0x3), region = 64 }
  0xe9   :  { %195 = vsyncpa [#allocation3], 1 }
  0xea   :  { %197 = vsyncpa [#allocation3 + $0x1], 1 }

</bundles_post_ra>
